<compile_context>
chip_gen: v7x
topology: tpu7x:2x2x1
jax: 0.10.0
libtpu: 0.0.40
codegen_flags: <defaults>
</compile_context>

<pallas_src>
import jax
import jax.numpy as jnp
from jax.experimental import pallas as pl
from jax.experimental.pallas import tpu as pltpu

EPS = 1e-5  # PyTorch BatchNorm2d default eps

# kernel-tap index of the 4x4 transposed-conv kernel, by output parity and tap offset:
# _TAP[parity (0/1)][tap (0/1)]
_TAP = ((3, 1), (2, 0))


# ----------------------------- Pallas kernels ------------------------------ #

def _mm_bn_stats_kernel(p_ref, w_ref, y_ref, sum_ref, ssq_ref,
                        acc_ref, s1_ref, s2_ref):
    """Tiled bf16 matmul (f32 accumulate) + per-column sum / sum-of-squares.

    grid = (n_blocks, parity, m_blocks, k_blocks).  The BN statistics accumulate
    in VMEM scratch across (parity, m, k) and are written out once per n block.
    """
    pp = pl.program_id(1)
    pi = pl.program_id(2)
    pk = pl.program_id(3)
    n_p = pl.num_programs(1)
    n_i = pl.num_programs(2)
    n_k = pl.num_programs(3)

    @pl.when((pp == 0) & (pi == 0) & (pk == 0))
    def _():
        s1_ref[...] = jnp.zeros_like(s1_ref)
        s2_ref[...] = jnp.zeros_like(s2_ref)

    @pl.when(pk == 0)
    def _():
        acc_ref[...] = jnp.zeros_like(acc_ref)

    acc_ref[...] += jnp.dot(p_ref[...], w_ref[...],
                            preferred_element_type=jnp.float32)

    @pl.when(pk == n_k - 1)
    def _():
        y = acc_ref[...]
        y_ref[...] = y
        s1_ref[...] += jnp.sum(y, axis=0, keepdims=True)
        s2_ref[...] += jnp.sum(y * y, axis=0, keepdims=True)

    @pl.when((pp == n_p - 1) & (pi == n_i - 1) & (pk == n_k - 1))
    def _():
        sum_ref[...] = s1_ref[...]
        ssq_ref[...] = s2_ref[...]


def _mm_tanh_kernel(p_ref, w_ref, y_ref, acc_ref):
    """Tiled bf16 matmul (f32 accumulate) with tanh fused into the epilogue."""
    pk = pl.program_id(3)
    n_k = pl.num_programs(3)

    @pl.when(pk == 0)
    def _():
        acc_ref[...] = jnp.zeros_like(acc_ref)

    acc_ref[...] += jnp.dot(p_ref[...], w_ref[...],
                            preferred_element_type=jnp.float32)

    @pl.when(pk == n_k - 1)
    def _():
        y_ref[...] = jnp.tanh(acc_ref[...])


def _bn_relu_kernel(y_ref, scale_ref, shift_ref, o_ref):
    """Elementwise BatchNorm apply (y*scale + shift) + ReLU."""
    o_ref[...] = jnp.maximum(y_ref[...] * scale_ref[...] + shift_ref[...], 0.0)


# ------------------------------ tiling helpers ------------------------------ #

def _round_up(x, m):
    return (x + m - 1) // m * m


def _tiles(m, k, n):
    """Pick MXU/(8,128)-friendly tiles; pad dims up to multiples of the tiles."""
    tn = 128 if n <= 128 else 256
    tk = 128 if k <= 128 else (256 if k <= 512 else 512)
    tm = min(512, _round_up(m, 8))
    return tm, tk, tn, _round_up(m, tm), _round_up(k, tk), _round_up(n, tn)


def _pad_cast(patches, wmats, mp, kp, np_):
    P, M, K = patches.shape
    N = wmats.shape[2]
    p = jnp.pad(patches, ((0, 0), (0, mp - M), (0, kp - K))).astype(jnp.bfloat16)
    w = jnp.pad(wmats, ((0, 0), (0, kp - K), (0, np_ - N))).astype(jnp.bfloat16)
    return p, w


# --------------------------- pallas_call wrappers --------------------------- #

def _matmul_bn_stats(patches, wmats):
    """patches (P,M,K), wmats (P,K,N) -> y (P,Mp,Np) f32, col-sum (1,Np), col-sumsq (1,Np)."""
    P, M, K = patches.shape
    N = wmats.shape[2]
    tm, tk, tn, Mp, Kp, Np = _tiles(M, K, N)
    pb, wb = _pad_cast(patches, wmats, Mp, Kp, Np)
    grid = (Np // tn, P, Mp // tm, Kp // tk)
    y, s1, s2 = pl.pallas_call(
        _mm_bn_stats_kernel,
        out_shape=(jax.ShapeDtypeStruct((P, Mp, Np), jnp.float32),
                   jax.ShapeDtypeStruct((1, Np), jnp.float32),
                   jax.ShapeDtypeStruct((1, Np), jnp.float32)),
        grid_spec=pltpu.PrefetchScalarGridSpec(
            num_scalar_prefetch=0,
            grid=grid,
            in_specs=[
                pl.BlockSpec((None, tm, tk), lambda j, p, i, k: (p, i, k)),
                pl.BlockSpec((None, tk, tn), lambda j, p, i, k: (p, k, j)),
            ],
            out_specs=[
                pl.BlockSpec((None, tm, tn), lambda j, p, i, k: (p, i, j)),
                pl.BlockSpec((1, tn), lambda j, p, i, k: (0, j)),
                pl.BlockSpec((1, tn), lambda j, p, i, k: (0, j)),
            ],
            scratch_shapes=[pltpu.VMEM((tm, tn), jnp.float32),
                            pltpu.VMEM((1, tn), jnp.float32),
                            pltpu.VMEM((1, tn), jnp.float32)],
        ),
        compiler_params=pltpu.CompilerParams(
            dimension_semantics=("parallel", "arbitrary", "arbitrary", "arbitrary")),
    )(pb, wb)
    return y, s1, s2, (tm, tn, Mp, Np)


def _matmul_tanh(patches, wmats):
    """patches (P,M,K), wmats (P,K,N) -> tanh(patches @ wmats) (P,M,N) f32."""
    P, M, K = patches.shape
    N = wmats.shape[2]
    tm, tk, tn, Mp, Kp, Np = _tiles(M, K, N)
    pb, wb = _pad_cast(patches, wmats, Mp, Kp, Np)
    grid = (Np // tn, P, Mp // tm, Kp // tk)
    y = pl.pallas_call(
        _mm_tanh_kernel,
        out_shape=jax.ShapeDtypeStruct((P, Mp, Np), jnp.float32),
        grid_spec=pltpu.PrefetchScalarGridSpec(
            num_scalar_prefetch=0,
            grid=grid,
            in_specs=[
                pl.BlockSpec((None, tm, tk), lambda j, p, i, k: (p, i, k)),
                pl.BlockSpec((None, tk, tn), lambda j, p, i, k: (p, k, j)),
            ],
            out_specs=pl.BlockSpec((None, tm, tn), lambda j, p, i, k: (p, i, j)),
            scratch_shapes=[pltpu.VMEM((tm, tn), jnp.float32)],
        ),
        compiler_params=pltpu.CompilerParams(
            dimension_semantics=("parallel", "parallel", "parallel", "arbitrary")),
    )(pb, wb)
    return y[:, :M, :N]


def _bn_relu_apply(y2d, scale, shift, tm, tn):
    M, N = y2d.shape
    grid = (M // tm, N // tn)
    return pl.pallas_call(
        _bn_relu_kernel,
        out_shape=jax.ShapeDtypeStruct((M, N), jnp.float32),
        grid_spec=pltpu.PrefetchScalarGridSpec(
            num_scalar_prefetch=0,
            grid=grid,
            in_specs=[pl.BlockSpec((tm, tn), lambda i, j: (i, j)),
                      pl.BlockSpec((1, tn), lambda i, j: (0, j)),
                      pl.BlockSpec((1, tn), lambda i, j: (0, j))],
            out_specs=pl.BlockSpec((tm, tn), lambda i, j: (i, j)),
        ),
        compiler_params=pltpu.CompilerParams(
            dimension_semantics=("parallel", "parallel")),
    )(y2d, scale, shift)


def _bn_relu_layer(patches, wmats, gamma, beta):
    """matmul + training-mode BatchNorm + ReLU.  Returns (P, M, N) f32."""
    P, M, _ = patches.shape
    N = wmats.shape[2]
    y, s1, s2, (tm, tn, Mp, Np) = _matmul_bn_stats(patches, wmats)
    count = P * M  # true (batch x spatial) samples per channel; padded rows are zero
    mean = s1[0, :N] / count
    var = jnp.maximum(s2[0, :N] / count - mean * mean, 0.0)
    scale = gamma * jax.lax.rsqrt(var + EPS)
    shift = beta - mean * scale
    scale_p = jnp.pad(scale, (0, Np - N)).reshape(1, Np)
    shift_p = jnp.pad(shift, (0, Np - N)).reshape(1, Np)
    a = _bn_relu_apply(y.reshape(P * Mp, Np), scale_p, shift_p, tm, tn)
    return a.reshape(P, Mp, Np)[:, :M, :N]


# -------------------- sub-pixel conv-transpose decomposition ---------------- #

def _subpixel_patches(h):
    """NHWC activation (B,H,W,Cin) -> (4, B*H*W, 4*Cin) patches, no zero-insertion."""
    B, H, W, Cin = h.shape
    hp = jnp.pad(h, ((0, 0), (1, 1), (1, 1), (0, 0)))
    parts = []
    for py in range(2):
        for px in range(2):
            taps = [hp[:, py + dy:py + dy + H, px + dx:px + dx + W, :]
                    for dy in range(2) for dx in range(2)]
            parts.append(jnp.stack(taps, axis=3).reshape(B * H * W, 4 * Cin))
    return jnp.stack(parts, axis=0)


def _subpixel_weights(w):
    """ConvTranspose2d weight (Cin, Cout, 4, 4) -> (4, 4*Cin, Cout) sub-pixel matrices."""
    Cin, Cout = w.shape[0], w.shape[1]
    mats = []
    for py in range(2):
        for px in range(2):
            taps = [w[:, :, _TAP[py][dy], _TAP[px][dx]]
                    for dy in range(2) for dx in range(2)]
            mats.append(jnp.stack(taps, axis=0).reshape(4 * Cin, Cout))
    return jnp.stack(mats, axis=0)


def _depth_to_space(a, B, H, W, s):
    """(s*s, B*H*W, C) with parity p = py*s + px -> NHWC (B, s*H, s*W, C)."""
    C = a.shape[-1]
    a = a.reshape(s, s, B, H, W, C)
    a = jnp.transpose(a, (2, 3, 0, 4, 1, 5))
    return a.reshape(B, H * s, W * s, C)


# --------------------------------- layers ---------------------------------- #

def initial_layer(x, w, gamma, beta):
    """ConvTranspose2d(k, C, 4, 1, 0)+BN+ReLU on (B,k,1,1) input -> NHWC (B,4,4,C)."""
    B, Cin = x.shape[0], x.shape[1]
    Cout = w.shape[1]
    x2 = x.reshape(B, Cin).astype(jnp.float32)
    patches = jnp.broadcast_to(x2, (16, B, Cin))               # one "parity" per tap
    wm = jnp.transpose(w, (2, 3, 0, 1)).reshape(16, Cin, Cout)  # p = ky*4 + kx
    a = _bn_relu_layer(patches, wm, gamma, beta)
    return _depth_to_space(a, B, 1, 1, 4)


def pyramid_layer(h, w, gamma, beta):
    """ConvTranspose2d(Cin, Cout, 4, 2, 1)+BN+ReLU, NHWC in/out (spatial x2)."""
    B, H, W, _ = h.shape
    a = _bn_relu_layer(_subpixel_patches(h), _subpixel_weights(w), gamma, beta)
    return _depth_to_space(a, B, H, W, 2)


def final_layer(h, w):
    """ConvTranspose2d(Cin, nc, 4, 2, 1)+Tanh, NHWC in -> NCHW out."""
    B, H, W, _ = h.shape
    y = _matmul_tanh(_subpixel_patches(h), _subpixel_weights(w))
    out = _depth_to_space(y, B, H, W, 2)
    return jnp.transpose(out, (0, 3, 1, 2))


# ------------------------------ Decoder module ------------------------------ #

def init_decoder_params(key, isize, nc, k=100, ngf=64):
    """Deterministic DCGAN-style init mirroring Decoder.__init__ structure."""
    assert isize % 16 == 0, 'isize has to be a multiple of 16'
    cngf, tisize = ngf // 2, 4
    while tisize != isize:
        cngf *= 2
        tisize *= 2
    keys = iter(jax.random.split(key, 64))
    blocks = []
    # initial: ConvTranspose2d(k, cngf, 4, 1, 0) + BN + ReLU
    w = 0.02 * jax.random.normal(next(keys), (k, cngf, 4, 4), jnp.float32)
    g = 1.0 + 0.02 * jax.random.normal(next(keys), (cngf,), jnp.float32)
    b = jnp.zeros((cngf,), jnp.float32)
    blocks.append(dict(w=w, gamma=g, beta=b))
    csize = 4
    while csize < isize // 2:
        # pyramid: ConvTranspose2d(cngf, cngf//2, 4, 2, 1) + BN + ReLU
        w = 0.02 * jax.random.normal(next(keys), (cngf, cngf // 2, 4, 4), jnp.float32)
        g = 1.0 + 0.02 * jax.random.normal(next(keys), (cngf // 2,), jnp.float32)
        b = jnp.zeros((cngf // 2,), jnp.float32)
        blocks.append(dict(w=w, gamma=g, beta=b))
        cngf //= 2
        csize *= 2
    # final: ConvTranspose2d(cngf, nc, 4, 2, 1) + Tanh
    w_final = 0.02 * jax.random.normal(next(keys), (cngf, nc, 4, 4), jnp.float32)
    return dict(blocks=blocks, final_w=w_final)


def decoder_forward(x, params):
    blocks = params['blocks']
    h = initial_layer(x, blocks[0]['w'], blocks[0]['gamma'], blocks[0]['beta'])
    for layer in blocks[1:]:
        h = pyramid_layer(h, layer['w'], layer['gamma'], layer['beta'])
    return final_layer(h, params['final_w'])


# ------------------------------ pure-JAX reference -------------------------- #

def _ref_convt(x, w, stride, pad):
    K = w.shape[2]
    wr = jnp.transpose(w[:, :, ::-1, ::-1], (1, 0, 2, 3))  # (Cout, Cin, K, K)
    p = K - 1 - pad
    return jax.lax.conv_general_dilated(
        x, wr, window_strides=(1, 1), padding=[(p, p), (p, p)],
        lhs_dilation=(stride, stride),
        dimension_numbers=('NCHW', 'OIHW', 'NCHW'))


def decoder_reference(x, params):
    h = x.astype(jnp.float32)
    blocks = params['blocks']
    strides = [(1, 0)] + [(2, 1)] * (len(blocks) - 1)
    for layer, (s, p) in zip(blocks, strides):
        y = _ref_convt(h, layer['w'], s, p)
        mean = jnp.mean(y, axis=(0, 2, 3), keepdims=True)
        var = jnp.mean((y - mean) ** 2, axis=(0, 2, 3), keepdims=True)
        g = layer['gamma'].reshape(1, -1, 1, 1)
        b = layer['beta'].reshape(1, -1, 1, 1)
        h = jnp.maximum((y - mean) * jax.lax.rsqrt(var + EPS) * g + b, 0.0)
    return jnp.tanh(_ref_convt(h, params['final_w'], 2, 1))


# ----------------------------------- main ----------------------------------- #

def _run_and_check(B, isize, nc, k, ngf, seed, tol):
    key = jax.random.PRNGKey(seed)
    k_x, k_p = jax.random.split(key)
    params = init_decoder_params(k_p, isize, nc, k=k, ngf=ngf)
    x = jax.random.normal(k_x, (B, k, 1, 1), jnp.float32)

    fwd = jax.jit(decoder_forward)
    out = jax.block_until_ready(fwd(x, params))
    assert out.shape == (B, nc, isize, isize), out.shape

    ref = decoder_reference(x, params)
    max_err = float(jnp.max(jnp.abs(out - ref)))
    assert jnp.allclose(out, ref, atol=tol, rtol=tol), max_err
    return max_err


if __name__ == "__main__":
    # small config (matches the module's structure at toy sizes)
    _run_and_check(B=2, isize=16, nc=3, k=8, ngf=8, seed=0, tol=3e-2)
    # medium config: exercises multi-block K / M grids and multi-layer pyramid
    _run_and_check(B=4, isize=32, nc=3, k=16, ngf=32, seed=0, tol=3e-2)
    print("KERNEL_OK")
</pallas_src>

<mosaic_0001>
module attributes {stable_mosaic.version = 11 : i64} {
  func.func @_bn_relu_kernel(%arg0: i32, %arg1: i32, %arg2: memref<8x128xf32, #tpu.memory_space<vmem>>, %arg3: memref<1x128xf32, #tpu.memory_space<vmem>>, %arg4: memref<1x128xf32, #tpu.memory_space<vmem>>, %arg5: memref<8x128xf32, #tpu.memory_space<vmem>>) attributes {dimension_semantics = [#tpu.dimension_semantics<parallel>, #tpu.dimension_semantics<parallel>], iteration_bounds = array<i64: 16, 1>, scalar_prefetch = 0 : i64, scratch_operands = 0 : i64, tpu.core_type = #tpu.core_type<tc>, window_params = [{transform_indices = @transform_0, window_bounds = array<i64: 8, 128>}, {transform_indices = @transform_1, window_bounds = array<i64: 1, 128>}, {transform_indices = @transform_2, window_bounds = array<i64: 1, 128>}, {transform_indices = @transform_3, window_bounds = array<i64: 8, 128>}]} {
    %c0 = arith.constant 0 : index
    %c0_0 = arith.constant 0 : index
    %0 = vector.load %arg2[%c0, %c0_0] : memref<8x128xf32, #tpu.memory_space<vmem>>, vector<8x128xf32>
    %c0_1 = arith.constant 0 : index
    %c0_2 = arith.constant 0 : index
    %1 = vector.load %arg3[%c0_1, %c0_2] : memref<1x128xf32, #tpu.memory_space<vmem>>, vector<1x128xf32>
    %2 = vector.broadcast %1 : vector<1x128xf32> to vector<8x128xf32>
    %3 = arith.mulf %0, %2 : vector<8x128xf32>
    %c0_3 = arith.constant 0 : index
    %c0_4 = arith.constant 0 : index
    %4 = vector.load %arg4[%c0_3, %c0_4] : memref<1x128xf32, #tpu.memory_space<vmem>>, vector<1x128xf32>
    %5 = vector.broadcast %4 : vector<1x128xf32> to vector<8x128xf32>
    %6 = arith.addf %3, %5 : vector<8x128xf32>
    %cst = arith.constant 0.000000e+00 : f32
    %7 = vector.broadcast %cst : f32 to vector<8x128xf32>
    %8 = arith.maximumf %6, %7 : vector<8x128xf32>
    %c0_5 = arith.constant 0 : index
    %c0_6 = arith.constant 0 : index
    %9 = vector.load %arg5[%c0_5, %c0_6] : memref<8x128xf32, #tpu.memory_space<vmem>>, vector<8x128xf32>
    tpu.vector_store %arg5[%c0_5, %c0_6], %8 {strides = array<i32>} : memref<8x128xf32, #tpu.memory_space<vmem>>, vector<8x128xf32>,
    return
  }
  func.func @transform_0(%arg0: i32, %arg1: i32) -> (i32, i32) {
    %c0_i32 = arith.constant 0 : i32
    return %arg0, %arg1 : i32, i32
  }
  func.func @transform_1(%arg0: i32, %arg1: i32) -> (i32, i32) {
    %c0_i32 = arith.constant 0 : i32
    %c0_i32_0 = arith.constant 0 : i32
    return %c0_i32, %arg1 : i32, i32
  }
  func.func @transform_2(%arg0: i32, %arg1: i32) -> (i32, i32) {
    %c0_i32 = arith.constant 0 : i32
    %c0_i32_0 = arith.constant 0 : i32
    return %c0_i32, %arg1 : i32, i32
  }
  func.func @transform_3(%arg0: i32, %arg1: i32) -> (i32, i32) {
    %c0_i32 = arith.constant 0 : i32
    return %arg0, %arg1 : i32, i32
  }
}

module attributes {stable_mosaic.version = 11 : i64} {
  func.func @_mm_bn_stats_kernel(%arg0: i32, %arg1: i32, %arg2: i32, %arg3: i32, %arg4: memref<1x8x128xbf16, #tpu.memory_space<vmem>>, %arg5: memref<1x128x128xbf16, #tpu.memory_space<vmem>>, %arg6: memref<1x8x128xf32, #tpu.memory_space<vmem>>, %arg7: memref<1x128xf32, #tpu.memory_space<vmem>>, %arg8: memref<1x128xf32, #tpu.memory_space<vmem>>, %arg9: memref<8x128xf32, #tpu.memory_space<vmem>>, %arg10: memref<1x128xf32, #tpu.memory_space<vmem>>, %arg11: memref<1x128xf32, #tpu.memory_space<vmem>>) attributes {dimension_semantics = [#tpu.dimension_semantics<parallel>, #tpu.dimension_semantics<arbitrary>, #tpu.dimension_semantics<arbitrary>, #tpu.dimension_semantics<arbitrary>], iteration_bounds = array<i64: 1, 16, 1, 1>, scalar_prefetch = 0 : i64, scratch_operands = 3 : i64, tpu.core_type = #tpu.core_type<tc>, window_params = [{transform_indices = @transform_0, window_bounds = array<i64: 1, 8, 128>}, {transform_indices = @transform_1, window_bounds = array<i64: 1, 128, 128>}, {transform_indices = @transform_2, window_bounds = array<i64: 1, 8, 128>}, {transform_indices = @transform_3, window_bounds = array<i64: 1, 128>}, {transform_indices = @transform_4, window_bounds = array<i64: 1, 128>}]} {
    %c0_i32 = arith.constant 0 : i32
    %0 = arith.cmpi eq, %arg1, %c0_i32 : i32
    %c0_i32_0 = arith.constant 0 : i32
    %1 = arith.cmpi eq, %arg2, %c0_i32_0 : i32
    %2 = arith.andi %0, %1 : i1
    %c0_i32_1 = arith.constant 0 : i32
    %3 = arith.cmpi eq, %arg3, %c0_i32_1 : i32
    %4 = arith.andi %2, %3 : i1
    %5 = arith.extui %4 : i1 to i32
    %c0_i32_2 = arith.constant 0 : i32
    %6 = arith.cmpi ne, %5, %c0_i32_2 : i32
    scf.if %6 {
      %cst_19 = arith.constant 0.000000e+00 : f32
      %28 = vector.broadcast %cst_19 : f32 to vector<1x128xf32>
      %c0_20 = arith.constant 0 : index
      %c0_21 = arith.constant 0 : index
      %29 = vector.load %arg10[%c0_20, %c0_21] : memref<1x128xf32, #tpu.memory_space<vmem>>, vector<1x128xf32>
      tpu.vector_store %arg10[%c0_20, %c0_21], %28 {strides = array<i32>} : memref<1x128xf32, #tpu.memory_space<vmem>>, vector<1x128xf32>,
      %cst_22 = arith.constant 0.000000e+00 : f32
      %30 = vector.broadcast %cst_22 : f32 to vector<1x128xf32>
      %c0_23 = arith.constant 0 : index
      %c0_24 = arith.constant 0 : index
      %31 = vector.load %arg11[%c0_23, %c0_24] : memref<1x128xf32, #tpu.memory_space<vmem>>, vector<1x128xf32>
      tpu.vector_store %arg11[%c0_23, %c0_24], %30 {strides = array<i32>} : memref<1x128xf32, #tpu.memory_space<vmem>>, vector<1x128xf32>,
    } else {
    }
    %c0_i32_3 = arith.constant 0 : i32
    %7 = arith.cmpi eq, %arg3, %c0_i32_3 : i32
    %8 = arith.extui %7 : i1 to i32
    %c0_i32_4 = arith.constant 0 : i32
    %9 = arith.cmpi ne, %8, %c0_i32_4 : i32
    scf.if %9 {
      %cst_19 = arith.constant 0.000000e+00 : f32
      %28 = vector.broadcast %cst_19 : f32 to vector<8x128xf32>
      %c0_20 = arith.constant 0 : index
      %c0_21 = arith.constant 0 : index
      %29 = vector.load %arg9[%c0_20, %c0_21] : memref<8x128xf32, #tpu.memory_space<vmem>>, vector<8x128xf32>
      tpu.vector_store %arg9[%c0_20, %c0_21], %28 {strides = array<i32>} : memref<8x128xf32, #tpu.memory_space<vmem>>, vector<8x128xf32>,
    } else {
    }
    %c0 = arith.constant 0 : index
    %c0_5 = arith.constant 0 : index
    %10 = vector.load %arg9[%c0, %c0_5] : memref<8x128xf32, #tpu.memory_space<vmem>>, vector<8x128xf32>
    %c0_6 = arith.constant 0 : index
    %c0_7 = arith.constant 0 : index
    %c0_8 = arith.constant 0 : index
    %11 = vector.load %arg4[%c0_6, %c0_7, %c0_8] : memref<1x8x128xbf16, #tpu.memory_space<vmem>>, vector<1x8x128xbf16>
    %12 = vector.shape_cast %11 : vector<1x8x128xbf16> to vector<8x128xbf16>
    %c0_9 = arith.constant 0 : index
    %c0_10 = arith.constant 0 : index
    %c0_11 = arith.constant 0 : index
    %13 = vector.load %arg5[%c0_9, %c0_10, %c0_11] : memref<1x128x128xbf16, #tpu.memory_space<vmem>>, vector<1x128x128xbf16>
    %14 = vector.shape_cast %13 : vector<1x128x128xbf16> to vector<128x128xbf16>
    %cst = arith.constant dense<0.000000e+00> : vector<8x128xf32>
    %15 = tpu.matmul %12, %14, %cst {dimension_numbers = #tpu.dot_dimension_numbers<[1], [0], [0], [1], [0, 0, 1, 1], [], []>} : vector<8x128xbf16>, vector<128x128xbf16>, vector<8x128xf32> -> vector<8x128xf32>
    %16 = arith.addf %10, %15 : vector<8x128xf32>
    %c0_12 = arith.constant 0 : index
    %c0_13 = arith.constant 0 : index
    %17 = vector.load %arg9[%c0_12, %c0_13] : memref<8x128xf32, #tpu.memory_space<vmem>>, vector<8x128xf32>
    tpu.vector_store %arg9[%c0_12, %c0_13], %16 {strides = array<i32>} : memref<8x128xf32, #tpu.memory_space<vmem>>, vector<8x128xf32>,
    %c0_i32_14 = arith.constant 0 : i32
    %18 = arith.cmpi eq, %arg3, %c0_i32_14 : i32
    %19 = arith.extui %18 : i1 to i32
    %c0_i32_15 = arith.constant 0 : i32
    %20 = arith.cmpi ne, %19, %c0_i32_15 : i32
    scf.if %20 {
      %c0_19 = arith.constant 0 : index
      %c0_20 = arith.constant 0 : index
      %28 = vector.load %arg9[%c0_19, %c0_20] : memref<8x128xf32, #tpu.memory_space<vmem>>, vector<8x128xf32>
      %c0_21 = arith.constant 0 : index
      %c0_22 = arith.constant 0 : index
      %c0_23 = arith.constant 0 : index
      %29 = vector.load %arg6[%c0_21, %c0_22, %c0_23] : memref<1x8x128xf32, #tpu.memory_space<vmem>>, vector<1x8x128xf32>
      %30 = vector.shape_cast %29 : vector<1x8x128xf32> to vector<8x128xf32>
      %31 = vector.shape_cast %28 : vector<8x128xf32> to vector<1x8x128xf32>
      tpu.vector_store %arg6[%c0_21, %c0_22, %c0_23], %31 {strides = array<i32>} : memref<1x8x128xf32, #tpu.memory_space<vmem>>, vector<1x8x128xf32>,
      %c0_24 = arith.constant 0 : index
      %c0_25 = arith.constant 0 : index
      %32 = vector.load %arg10[%c0_24, %c0_25] : memref<1x128xf32, #tpu.memory_space<vmem>>, vector<1x128xf32>
      %cst_26 = arith.constant dense<0.000000e+00> : vector<128xf32>
      %33 = vector.multi_reduction <add>, %28, %cst_26 [0] : vector<8x128xf32> to vector<128xf32>
      %34 = vector.shape_cast %33 : vector<128xf32> to vector<1x128xf32>
      %35 = arith.addf %32, %34 : vector<1x128xf32>
      %c0_27 = arith.constant 0 : index
      %c0_28 = arith.constant 0 : index
      %36 = vector.load %arg10[%c0_27, %c0_28] : memref<1x128xf32, #tpu.memory_space<vmem>>, vector<1x128xf32>
      tpu.vector_store %arg10[%c0_27, %c0_28], %35 {strides = array<i32>} : memref<1x128xf32, #tpu.memory_space<vmem>>, vector<1x128xf32>,
      %c0_29 = arith.constant 0 : index
      %c0_30 = arith.constant 0 : index
      %37 = vector.load %arg11[%c0_29, %c0_30] : memref<1x128xf32, #tpu.memory_space<vmem>>, vector<1x128xf32>
      %38 = arith.mulf %28, %28 : vector<8x128xf32>
      %cst_31 = arith.constant dense<0.000000e+00> : vector<128xf32>
      %39 = vector.multi_reduction <add>, %38, %cst_31 [0] : vector<8x128xf32> to vector<128xf32>
      %40 = vector.shape_cast %39 : vector<128xf32> to vector<1x128xf32>
      %41 = arith.addf %37, %40 : vector<1x128xf32>
      %c0_32 = arith.constant 0 : index
      %c0_33 = arith.constant 0 : index
      %42 = vector.load %arg11[%c0_32, %c0_33] : memref<1x128xf32, #tpu.memory_space<vmem>>, vector<1x128xf32>
      tpu.vector_store %arg11[%c0_32, %c0_33], %41 {strides = array<i32>} : memref<1x128xf32, #tpu.memory_space<vmem>>, vector<1x128xf32>,
    } else {
    }
    %c15_i32 = arith.constant 15 : i32
    %21 = arith.cmpi eq, %arg1, %c15_i32 : i32
    %c0_i32_16 = arith.constant 0 : i32
    %22 = arith.cmpi eq, %arg2, %c0_i32_16 : i32
    %23 = arith.andi %21, %22 : i1
    %c0_i32_17 = arith.constant 0 : i32
    %24 = arith.cmpi eq, %arg3, %c0_i32_17 : i32
    %25 = arith.andi %23, %24 : i1
    %26 = arith.extui %25 : i1 to i32
    %c0_i32_18 = arith.constant 0 : i32
    %27 = arith.cmpi ne, %26, %c0_i32_18 : i32
    scf.if %27 {
      %c0_19 = arith.constant 0 : index
      %c0_20 = arith.constant 0 : index
      %28 = vector.load %arg10[%c0_19, %c0_20] : memref<1x128xf32, #tpu.memory_space<vmem>>, vector<1x128xf32>
      %c0_21 = arith.constant 0 : index
      %c0_22 = arith.constant 0 : index
      %29 = vector.load %arg7[%c0_21, %c0_22] : memref<1x128xf32, #tpu.memory_space<vmem>>, vector<1x128xf32>
      tpu.vector_store %arg7[%c0_21, %c0_22], %28 {strides = array<i32>} : memref<1x128xf32, #tpu.memory_space<vmem>>, vector<1x128xf32>,
      %c0_23 = arith.constant 0 : index
      %c0_24 = arith.constant 0 : index
      %30 = vector.load %arg11[%c0_23, %c0_24] : memref<1x128xf32, #tpu.memory_space<vmem>>, vector<1x128xf32>
      %c0_25 = arith.constant 0 : index
      %c0_26 = arith.constant 0 : index
      %31 = vector.load %arg8[%c0_25, %c0_26] : memref<1x128xf32, #tpu.memory_space<vmem>>, vector<1x128xf32>
      tpu.vector_store %arg8[%c0_25, %c0_26], %30 {strides = array<i32>} : memref<1x128xf32, #tpu.memory_space<vmem>>, vector<1x128xf32>,
    } else {
    }
    return
  }
  func.func @transform_0(%arg0: i32, %arg1: i32, %arg2: i32, %arg3: i32) -> (i32, i32, i32) {
    %c0_i32 = arith.constant 0 : i32
    return %arg1, %arg2, %arg3 : i32, i32, i32
  }
  func.func @transform_1(%arg0: i32, %arg1: i32, %arg2: i32, %arg3: i32) -> (i32, i32, i32) {
    %c0_i32 = arith.constant 0 : i32
    return %arg1, %arg3, %arg0 : i32, i32, i32
  }
  func.func @transform_2(%arg0: i32, %arg1: i32, %arg2: i32, %arg3: i32) -> (i32, i32, i32) {
    %c0_i32 = arith.constant 0 : i32
    return %arg1, %arg2, %arg0 : i32, i32, i32
  }
  func.func @transform_3(%arg0: i32, %arg1: i32, %arg2: i32, %arg3: i32) -> (i32, i32) {
    %c0_i32 = arith.constant 0 : i32
    %c0_i32_0 = arith.constant 0 : i32
    return %c0_i32, %arg0 : i32, i32
  }
  func.func @transform_4(%arg0: i32, %arg1: i32, %arg2: i32, %arg3: i32) -> (i32, i32) {
    %c0_i32 = arith.constant 0 : i32
    %c0_i32_0 = arith.constant 0 : i32
    return %c0_i32, %arg0 : i32, i32
  }
}

module attributes {stable_mosaic.version = 11 : i64} {
  func.func @_bn_relu_kernel(%arg0: i32, %arg1: i32, %arg2: memref<32x128xf32, #tpu.memory_space<vmem>>, %arg3: memref<1x128xf32, #tpu.memory_space<vmem>>, %arg4: memref<1x128xf32, #tpu.memory_space<vmem>>, %arg5: memref<32x128xf32, #tpu.memory_space<vmem>>) attributes {dimension_semantics = [#tpu.dimension_semantics<parallel>, #tpu.dimension_semantics<parallel>], iteration_bounds = array<i64: 4, 1>, scalar_prefetch = 0 : i64, scratch_operands = 0 : i64, tpu.core_type = #tpu.core_type<tc>, window_params = [{transform_indices = @transform_0, window_bounds = array<i64: 32, 128>}, {transform_indices = @transform_1, window_bounds = array<i64: 1, 128>}, {transform_indices = @transform_2, window_bounds = array<i64: 1, 128>}, {transform_indices = @transform_3, window_bounds = array<i64: 32, 128>}]} {
    %c0 = arith.constant 0 : index
    %c0_0 = arith.constant 0 : index
    %0 = vector.load %arg2[%c0, %c0_0] : memref<32x128xf32, #tpu.memory_space<vmem>>, vector<32x128xf32>
    %c0_1 = arith.constant 0 : index
    %c0_2 = arith.constant 0 : index
    %1 = vector.load %arg3[%c0_1, %c0_2] : memref<1x128xf32, #tpu.memory_space<vmem>>, vector<1x128xf32>
    %2 = vector.broadcast %1 : vector<1x128xf32> to vector<32x128xf32>
    %3 = arith.mulf %0, %2 : vector<32x128xf32>
    %c0_3 = arith.constant 0 : index
    %c0_4 = arith.constant 0 : index
    %4 = vector.load %arg4[%c0_3, %c0_4] : memref<1x128xf32, #tpu.memory_space<vmem>>, vector<1x128xf32>
    %5 = vector.broadcast %4 : vector<1x128xf32> to vector<32x128xf32>
    %6 = arith.addf %3, %5 : vector<32x128xf32>
    %cst = arith.constant 0.000000e+00 : f32
    %7 = vector.broadcast %cst : f32 to vector<32x128xf32>
    %8 = arith.maximumf %6, %7 : vector<32x128xf32>
    %c0_5 = arith.constant 0 : index
    %c0_6 = arith.constant 0 : index
    %9 = vector.load %arg5[%c0_5, %c0_6] : memref<32x128xf32, #tpu.memory_space<vmem>>, vector<32x128xf32>
    tpu.vector_store %arg5[%c0_5, %c0_6], %8 {strides = array<i32>} : memref<32x128xf32, #tpu.memory_space<vmem>>, vector<32x128xf32>,
    return
  }
  func.func @transform_0(%arg0: i32, %arg1: i32) -> (i32, i32) {
    %c0_i32 = arith.constant 0 : i32
    return %arg0, %arg1 : i32, i32
  }
  func.func @transform_1(%arg0: i32, %arg1: i32) -> (i32, i32) {
    %c0_i32 = arith.constant 0 : i32
    %c0_i32_0 = arith.constant 0 : i32
    return %c0_i32, %arg1 : i32, i32
  }
  func.func @transform_2(%arg0: i32, %arg1: i32) -> (i32, i32) {
    %c0_i32 = arith.constant 0 : i32
    %c0_i32_0 = arith.constant 0 : i32
    return %c0_i32, %arg1 : i32, i32
  }
  func.func @transform_3(%arg0: i32, %arg1: i32) -> (i32, i32) {
    %c0_i32 = arith.constant 0 : i32
    return %arg0, %arg1 : i32, i32
  }
}

module attributes {stable_mosaic.version = 11 : i64} {
  func.func @_mm_bn_stats_kernel(%arg0: i32, %arg1: i32, %arg2: i32, %arg3: i32, %arg4: memref<1x32x128xbf16, #tpu.memory_space<vmem>>, %arg5: memref<1x128x128xbf16, #tpu.memory_space<vmem>>, %arg6: memref<1x32x128xf32, #tpu.memory_space<vmem>>, %arg7: memref<1x128xf32, #tpu.memory_space<vmem>>, %arg8: memref<1x128xf32, #tpu.memory_space<vmem>>, %arg9: memref<32x128xf32, #tpu.memory_space<vmem>>, %arg10: memref<1x128xf32, #tpu.memory_space<vmem>>, %arg11: memref<1x128xf32, #tpu.memory_space<vmem>>) attributes {dimension_semantics = [#tpu.dimension_semantics<parallel>, #tpu.dimension_semantics<arbitrary>, #tpu.dimension_semantics<arbitrary>, #tpu.dimension_semantics<arbitrary>], iteration_bounds = array<i64: 1, 4, 1, 1>, scalar_prefetch = 0 : i64, scratch_operands = 3 : i64, tpu.core_type = #tpu.core_type<tc>, window_params = [{transform_indices = @transform_0, window_bounds = array<i64: 1, 32, 128>}, {transform_indices = @transform_1, window_bounds = array<i64: 1, 128, 128>}, {transform_indices = @transform_2, window_bounds = array<i64: 1, 32, 128>}, {transform_indices = @transform_3, window_bounds = array<i64: 1, 128>}, {transform_indices = @transform_4, window_bounds = array<i64: 1, 128>}]} {
    %c0_i32 = arith.constant 0 : i32
    %0 = arith.cmpi eq, %arg1, %c0_i32 : i32
    %c0_i32_0 = arith.constant 0 : i32
    %1 = arith.cmpi eq, %arg2, %c0_i32_0 : i32
    %2 = arith.andi %0, %1 : i1
    %c0_i32_1 = arith.constant 0 : i32
    %3 = arith.cmpi eq, %arg3, %c0_i32_1 : i32
    %4 = arith.andi %2, %3 : i1
    %5 = arith.extui %4 : i1 to i32
    %c0_i32_2 = arith.constant 0 : i32
    %6 = arith.cmpi ne, %5, %c0_i32_2 : i32
    scf.if %6 {
      %cst_19 = arith.constant 0.000000e+00 : f32
      %28 = vector.broadcast %cst_19 : f32 to vector<1x128xf32>
      %c0_20 = arith.constant 0 : index
      %c0_21 = arith.constant 0 : index
      %29 = vector.load %arg10[%c0_20, %c0_21] : memref<1x128xf32, #tpu.memory_space<vmem>>, vector<1x128xf32>
      tpu.vector_store %arg10[%c0_20, %c0_21], %28 {strides = array<i32>} : memref<1x128xf32, #tpu.memory_space<vmem>>, vector<1x128xf32>,
      %cst_22 = arith.constant 0.000000e+00 : f32
      %30 = vector.broadcast %cst_22 : f32 to vector<1x128xf32>
      %c0_23 = arith.constant 0 : index
      %c0_24 = arith.constant 0 : index
      %31 = vector.load %arg11[%c0_23, %c0_24] : memref<1x128xf32, #tpu.memory_space<vmem>>, vector<1x128xf32>
      tpu.vector_store %arg11[%c0_23, %c0_24], %30 {strides = array<i32>} : memref<1x128xf32, #tpu.memory_space<vmem>>, vector<1x128xf32>,
    } else {
    }
    %c0_i32_3 = arith.constant 0 : i32
    %7 = arith.cmpi eq, %arg3, %c0_i32_3 : i32
    %8 = arith.extui %7 : i1 to i32
    %c0_i32_4 = arith.constant 0 : i32
    %9 = arith.cmpi ne, %8, %c0_i32_4 : i32
    scf.if %9 {
      %cst_19 = arith.constant 0.000000e+00 : f32
      %28 = vector.broadcast %cst_19 : f32 to vector<32x128xf32>
      %c0_20 = arith.constant 0 : index
      %c0_21 = arith.constant 0 : index
      %29 = vector.load %arg9[%c0_20, %c0_21] : memref<32x128xf32, #tpu.memory_space<vmem>>, vector<32x128xf32>
      tpu.vector_store %arg9[%c0_20, %c0_21], %28 {strides = array<i32>} : memref<32x128xf32, #tpu.memory_space<vmem>>, vector<32x128xf32>,
    } else {
    }
    %c0 = arith.constant 0 : index
    %c0_5 = arith.constant 0 : index
    %10 = vector.load %arg9[%c0, %c0_5] : memref<32x128xf32, #tpu.memory_space<vmem>>, vector<32x128xf32>
    %c0_6 = arith.constant 0 : index
    %c0_7 = arith.constant 0 : index
    %c0_8 = arith.constant 0 : index
    %11 = vector.load %arg4[%c0_6, %c0_7, %c0_8] : memref<1x32x128xbf16, #tpu.memory_space<vmem>>, vector<1x32x128xbf16>
    %12 = vector.shape_cast %11 : vector<1x32x128xbf16> to vector<32x128xbf16>
    %c0_9 = arith.constant 0 : index
    %c0_10 = arith.constant 0 : index
    %c0_11 = arith.constant 0 : index
    %13 = vector.load %arg5[%c0_9, %c0_10, %c0_11] : memref<1x128x128xbf16, #tpu.memory_space<vmem>>, vector<1x128x128xbf16>
    %14 = vector.shape_cast %13 : vector<1x128x128xbf16> to vector<128x128xbf16>
    %cst = arith.constant dense<0.000000e+00> : vector<32x128xf32>
    %15 = tpu.matmul %12, %14, %cst {dimension_numbers = #tpu.dot_dimension_numbers<[1], [0], [0], [1], [0, 0, 1, 1], [], []>} : vector<32x128xbf16>, vector<128x128xbf16>, vector<32x128xf32> -> vector<32x128xf32>
    %16 = arith.addf %10, %15 : vector<32x128xf32>
    %c0_12 = arith.constant 0 : index
    %c0_13 = arith.constant 0 : index
    %17 = vector.load %arg9[%c0_12, %c0_13] : memref<32x128xf32, #tpu.memory_space<vmem>>, vector<32x128xf32>
    tpu.vector_store %arg9[%c0_12, %c0_13], %16 {strides = array<i32>} : memref<32x128xf32, #tpu.memory_space<vmem>>, vector<32x128xf32>,
    %c0_i32_14 = arith.constant 0 : i32
    %18 = arith.cmpi eq, %arg3, %c0_i32_14 : i32
    %19 = arith.extui %18 : i1 to i32
    %c0_i32_15 = arith.constant 0 : i32
    %20 = arith.cmpi ne, %19, %c0_i32_15 : i32
    scf.if %20 {
      %c0_19 = arith.constant 0 : index
      %c0_20 = arith.constant 0 : index
      %28 = vector.load %arg9[%c0_19, %c0_20] : memref<32x128xf32, #tpu.memory_space<vmem>>, vector<32x128xf32>
      %c0_21 = arith.constant 0 : index
      %c0_22 = arith.constant 0 : index
      %c0_23 = arith.constant 0 : index
      %29 = vector.load %arg6[%c0_21, %c0_22, %c0_23] : memref<1x32x128xf32, #tpu.memory_space<vmem>>, vector<1x32x128xf32>
      %30 = vector.shape_cast %29 : vector<1x32x128xf32> to vector<32x128xf32>
      %31 = vector.shape_cast %28 : vector<32x128xf32> to vector<1x32x128xf32>
      tpu.vector_store %arg6[%c0_21, %c0_22, %c0_23], %31 {strides = array<i32>} : memref<1x32x128xf32, #tpu.memory_space<vmem>>, vector<1x32x128xf32>,
      %c0_24 = arith.constant 0 : index
      %c0_25 = arith.constant 0 : index
      %32 = vector.load %arg10[%c0_24, %c0_25] : memref<1x128xf32, #tpu.memory_space<vmem>>, vector<1x128xf32>
      %cst_26 = arith.constant dense<0.000000e+00> : vector<128xf32>
      %33 = vector.multi_reduction <add>, %28, %cst_26 [0] : vector<32x128xf32> to vector<128xf32>
      %34 = vector.shape_cast %33 : vector<128xf32> to vector<1x128xf32>
      %35 = arith.addf %32, %34 : vector<1x128xf32>
      %c0_27 = arith.constant 0 : index
      %c0_28 = arith.constant 0 : index
      %36 = vector.load %arg10[%c0_27, %c0_28] : memref<1x128xf32, #tpu.memory_space<vmem>>, vector<1x128xf32>
      tpu.vector_store %arg10[%c0_27, %c0_28], %35 {strides = array<i32>} : memref<1x128xf32, #tpu.memory_space<vmem>>, vector<1x128xf32>,
      %c0_29 = arith.constant 0 : index
      %c0_30 = arith.constant 0 : index
      %37 = vector.load %arg11[%c0_29, %c0_30] : memref<1x128xf32, #tpu.memory_space<vmem>>, vector<1x128xf32>
      %38 = arith.mulf %28, %28 : vector<32x128xf32>
      %cst_31 = arith.constant dense<0.000000e+00> : vector<128xf32>
      %39 = vector.multi_reduction <add>, %38, %cst_31 [0] : vector<32x128xf32> to vector<128xf32>
      %40 = vector.shape_cast %39 : vector<128xf32> to vector<1x128xf32>
      %41 = arith.addf %37, %40 : vector<1x128xf32>
      %c0_32 = arith.constant 0 : index
      %c0_33 = arith.constant 0 : index
      %42 = vector.load %arg11[%c0_32, %c0_33] : memref<1x128xf32, #tpu.memory_space<vmem>>, vector<1x128xf32>
      tpu.vector_store %arg11[%c0_32, %c0_33], %41 {strides = array<i32>} : memref<1x128xf32, #tpu.memory_space<vmem>>, vector<1x128xf32>,
    } else {
    }
    %c3_i32 = arith.constant 3 : i32
    %21 = arith.cmpi eq, %arg1, %c3_i32 : i32
    %c0_i32_16 = arith.constant 0 : i32
    %22 = arith.cmpi eq, %arg2, %c0_i32_16 : i32
    %23 = arith.andi %21, %22 : i1
    %c0_i32_17 = arith.constant 0 : i32
    %24 = arith.cmpi eq, %arg3, %c0_i32_17 : i32
    %25 = arith.andi %23, %24 : i1
    %26 = arith.extui %25 : i1 to i32
    %c0_i32_18 = arith.constant 0 : i32
    %27 = arith.cmpi ne, %26, %c0_i32_18 : i32
    scf.if %27 {
      %c0_19 = arith.constant 0 : index
      %c0_20 = arith.constant 0 : index
      %28 = vector.load %arg10[%c0_19, %c0_20] : memref<1x128xf32, #tpu.memory_space<vmem>>, vector<1x128xf32>
      %c0_21 = arith.constant 0 : index
      %c0_22 = arith.constant 0 : index
      %29 = vector.load %arg7[%c0_21, %c0_22] : memref<1x128xf32, #tpu.memory_space<vmem>>, vector<1x128xf32>
      tpu.vector_store %arg7[%c0_21, %c0_22], %28 {strides = array<i32>} : memref<1x128xf32, #tpu.memory_space<vmem>>, vector<1x128xf32>,
      %c0_23 = arith.constant 0 : index
      %c0_24 = arith.constant 0 : index
      %30 = vector.load %arg11[%c0_23, %c0_24] : memref<1x128xf32, #tpu.memory_space<vmem>>, vector<1x128xf32>
      %c0_25 = arith.constant 0 : index
      %c0_26 = arith.constant 0 : index
      %31 = vector.load %arg8[%c0_25, %c0_26] : memref<1x128xf32, #tpu.memory_space<vmem>>, vector<1x128xf32>
      tpu.vector_store %arg8[%c0_25, %c0_26], %30 {strides = array<i32>} : memref<1x128xf32, #tpu.memory_space<vmem>>, vector<1x128xf32>,
    } else {
    }
    return
  }
  func.func @transform_0(%arg0: i32, %arg1: i32, %arg2: i32, %arg3: i32) -> (i32, i32, i32) {
    %c0_i32 = arith.constant 0 : i32
    return %arg1, %arg2, %arg3 : i32, i32, i32
  }
  func.func @transform_1(%arg0: i32, %arg1: i32, %arg2: i32, %arg3: i32) -> (i32, i32, i32) {
    %c0_i32 = arith.constant 0 : i32
    return %arg1, %arg3, %arg0 : i32, i32, i32
  }
  func.func @transform_2(%arg0: i32, %arg1: i32, %arg2: i32, %arg3: i32) -> (i32, i32, i32) {
    %c0_i32 = arith.constant 0 : i32
    return %arg1, %arg2, %arg0 : i32, i32, i32
  }
  func.func @transform_3(%arg0: i32, %arg1: i32, %arg2: i32, %arg3: i32) -> (i32, i32) {
    %c0_i32 = arith.constant 0 : i32
    %c0_i32_0 = arith.constant 0 : i32
    return %c0_i32, %arg0 : i32, i32
  }
  func.func @transform_4(%arg0: i32, %arg1: i32, %arg2: i32, %arg3: i32) -> (i32, i32) {
    %c0_i32 = arith.constant 0 : i32
    %c0_i32_0 = arith.constant 0 : i32
    return %c0_i32, %arg0 : i32, i32
  }
}

module attributes {stable_mosaic.version = 11 : i64} {
  func.func @_mm_tanh_kernel(%arg0: i32, %arg1: i32, %arg2: i32, %arg3: i32, %arg4: memref<1x128x128xbf16, #tpu.memory_space<vmem>>, %arg5: memref<1x128x128xbf16, #tpu.memory_space<vmem>>, %arg6: memref<1x128x128xf32, #tpu.memory_space<vmem>>, %arg7: memref<128x128xf32, #tpu.memory_space<vmem>>) attributes {dimension_semantics = [#tpu.dimension_semantics<parallel>, #tpu.dimension_semantics<parallel>, #tpu.dimension_semantics<parallel>, #tpu.dimension_semantics<arbitrary>], iteration_bounds = array<i64: 1, 4, 1, 1>, scalar_prefetch = 0 : i64, scratch_operands = 1 : i64, tpu.core_type = #tpu.core_type<tc>, window_params = [{transform_indices = @transform_0, window_bounds = array<i64: 1, 128, 128>}, {transform_indices = @transform_1, window_bounds = array<i64: 1, 128, 128>}, {transform_indices = @transform_2, window_bounds = array<i64: 1, 128, 128>}]} {
    %c0_i32 = arith.constant 0 : i32
    %0 = arith.cmpi eq, %arg3, %c0_i32 : i32
    %1 = arith.extui %0 : i1 to i32
    %c0_i32_0 = arith.constant 0 : i32
    %2 = arith.cmpi ne, %1, %c0_i32_0 : i32
    scf.if %2 {
      %cst_12 = arith.constant 0.000000e+00 : f32
      %14 = vector.broadcast %cst_12 : f32 to vector<128x128xf32>
      %c0_13 = arith.constant 0 : index
      %c0_14 = arith.constant 0 : index
      %15 = vector.load %arg7[%c0_13, %c0_14] : memref<128x128xf32, #tpu.memory_space<vmem>>, vector<128x128xf32>
      tpu.vector_store %arg7[%c0_13, %c0_14], %14 {strides = array<i32>} : memref<128x128xf32, #tpu.memory_space<vmem>>, vector<128x128xf32>,
    } else {
    }
    %c0 = arith.constant 0 : index
    %c0_1 = arith.constant 0 : index
    %3 = vector.load %arg7[%c0, %c0_1] : memref<128x128xf32, #tpu.memory_space<vmem>>, vector<128x128xf32>
    %c0_2 = arith.constant 0 : index
    %c0_3 = arith.constant 0 : index
    %c0_4 = arith.constant 0 : index
    %4 = vector.load %arg4[%c0_2, %c0_3, %c0_4] : memref<1x128x128xbf16, #tpu.memory_space<vmem>>, vector<1x128x128xbf16>
    %5 = vector.shape_cast %4 : vector<1x128x128xbf16> to vector<128x128xbf16>
    %c0_5 = arith.constant 0 : index
    %c0_6 = arith.constant 0 : index
    %c0_7 = arith.constant 0 : index
    %6 = vector.load %arg5[%c0_5, %c0_6, %c0_7] : memref<1x128x128xbf16, #tpu.memory_space<vmem>>, vector<1x128x128xbf16>
    %7 = vector.shape_cast %6 : vector<1x128x128xbf16> to vector<128x128xbf16>
    %cst = arith.constant dense<0.000000e+00> : vector<128x128xf32>
    %8 = tpu.matmul %5, %7, %cst {dimension_numbers = #tpu.dot_dimension_numbers<[1], [0], [0], [1], [0, 0, 1, 1], [], []>} : vector<128x128xbf16>, vector<128x128xbf16>, vector<128x128xf32> -> vector<128x128xf32>
    %9 = arith.addf %3, %8 : vector<128x128xf32>
    %c0_8 = arith.constant 0 : index
    %c0_9 = arith.constant 0 : index
    %10 = vector.load %arg7[%c0_8, %c0_9] : memref<128x128xf32, #tpu.memory_space<vmem>>, vector<128x128xf32>
    tpu.vector_store %arg7[%c0_8, %c0_9], %9 {strides = array<i32>} : memref<128x128xf32, #tpu.memory_space<vmem>>, vector<128x128xf32>,
    %c0_i32_10 = arith.constant 0 : i32
    %11 = arith.cmpi eq, %arg3, %c0_i32_10 : i32
    %12 = arith.extui %11 : i1 to i32
    %c0_i32_11 = arith.constant 0 : i32
    %13 = arith.cmpi ne, %12, %c0_i32_11 : i32
    scf.if %13 {
      %c0_12 = arith.constant 0 : index
      %c0_13 = arith.constant 0 : index
      %14 = vector.load %arg7[%c0_12, %c0_13] : memref<128x128xf32, #tpu.memory_space<vmem>>, vector<128x128xf32>
      %15 = math.tanh %14 : vector<128x128xf32>
      %c0_14 = arith.constant 0 : index
      %c0_15 = arith.constant 0 : index
      %c0_16 = arith.constant 0 : index
      %16 = vector.load %arg6[%c0_14, %c0_15, %c0_16] : memref<1x128x128xf32, #tpu.memory_space<vmem>>, vector<1x128x128xf32>
      %17 = vector.shape_cast %16 : vector<1x128x128xf32> to vector<128x128xf32>
      %18 = vector.shape_cast %15 : vector<128x128xf32> to vector<1x128x128xf32>
      tpu.vector_store %arg6[%c0_14, %c0_15, %c0_16], %18 {strides = array<i32>} : memref<1x128x128xf32, #tpu.memory_space<vmem>>, vector<1x128x128xf32>,
    } else {
    }
    return
  }
  func.func @transform_0(%arg0: i32, %arg1: i32, %arg2: i32, %arg3: i32) -> (i32, i32, i32) {
    %c0_i32 = arith.constant 0 : i32
    return %arg1, %arg2, %arg3 : i32, i32, i32
  }
  func.func @transform_1(%arg0: i32, %arg1: i32, %arg2: i32, %arg3: i32) -> (i32, i32, i32) {
    %c0_i32 = arith.constant 0 : i32
    return %arg1, %arg3, %arg0 : i32, i32, i32
  }
  func.func @transform_2(%arg0: i32, %arg1: i32, %arg2: i32, %arg3: i32) -> (i32, i32, i32) {
    %c0_i32 = arith.constant 0 : i32
    return %arg1, %arg2, %arg0 : i32, i32, i32
  }
}

</mosaic_0001>

<bundles_post_ra>
// kernel: decoder_forward.6
= control target key start
LH: loop header
LB: loop body
LE: loop exit
PB: predicated region body
PF: predicated region fallthrough
CT: control target
= control target key end

     0   :  { %s424_s12 = smov 0   ;;  %s426_s13 = smov 0   ;;  %s451_s0 = inlined_call_operand.vmem [shape: f32[128,128], index: 0, kind: input, shape index: {}]   ;;  %s452_s1 = inlined_call_operand.vmem [shape: f32[1,128], index: 1, kind: input, shape index: {}]   ;;  %s453_s2 = inlined_call_operand.vmem [shape: f32[1,128], index: 2, kind: input, shape index: {}]   ;;  %s454_s3 = inlined_call_operand.vmem [shape: f32[128,128], index: 3, kind: output, shape index: {}]  }
   0x1   :  { %s428_s14 = smov 0  }
   0x2 LB: > { %s25_s15 = sadd.s32 1, %s398_s13  ;;  %p349_p0 = scmp.ge.s32.totalorder %s402_s14, 1  ;;  %s402_s14 = sphi %s428_s14, %s13_s14   ;;  %s398_s13 = sphi %s426_s13, %s456_s13   ;;  %s394_s12 = sphi %s424_s12, %s455_s12  }
   0x3   : > { %p27_p1 = scmp.ge.s32.totalorder %s25_s15, 16  ;;  %p171_p2 = scmp.lt.s32.totalorder %s402_s14, 17 }
   0x5   : > { %s458_s15 = smov (%p27_p1, %s25_s15), 0  ;;  %p172_p3 = pnand %p349_p0, %p171_p2 }
   0x6   : > { %p205_p4 = scmp.lt.s32.totalorder (!%p172_p3), %s394_s12, 15  ;;  %v352_v0 = vld [vmem:[%s452_s1] ss:$0 sm:$0xff] (!%p172_p3) }
   0x7   : > { %175 = sbr.rel (%p172_p3) target bundleno = 25 (0x19), region = 32  ;;  %v353_v2 = vld [vmem:[%s453_s2] ss:$0 sm:$0xff] (!%p172_p3) }
   0xe   : > { %s460_s12 = smov (!%p205_p4, %s394_s12), 15 }
   0xf   : > { %s350_s16 = sshll.u32 %s460_s12, 3 }
  0x10   : > { %s211_s21 = scalar_lea.vmem %s451_s0, %s350_s16  ;;  %s224_s26 = scalar_lea.vmem %s454_s3, %s350_s16 }
  0x11   : > { %v225_v1 = vld [vmem:[%s211_s21] sm:$0xff] }
  0x12   : > { %v233_v3 = vmul.f32 %v352_v0, %v225_v1 }
  0x14   : > { %v241_v4 = vadd.f32 %v353_v2, %v233_v3 }
  0x16   : > { %v242_v5 = vmax.f32 %v241_v4, 0.0 }
  0x18   : > { %243 = vst [vmem:[%s224_s26] sm:$0xff] %v242_v5 }
  0x19 PF: > { %s13_s14 = sadd.s32 1, %s402_s14   ;;  %s455_s12 = smov %s398_s13 }
  0x1a   : > { %p10_p5 = scmp.ge.s32.totalorder %s13_s14, 18   ;;  %s456_s13 = smov %s458_s15 }
  0x1c   :  { %12 = sbr.rel (!%p10_p5) target bundleno = 2 (0x2), region = 68 }

// kernel: decoder_forward.5
= control target key start
LH: loop header
LB: loop body
LE: loop exit
PB: predicated region body
PF: predicated region fallthrough
CT: control target
= control target key end

     0   :  { %s785_s15 = smov 0   ;;  %s787_s16 = smov 0   ;;  %s851_s0 = inlined_call_operand.vmem [shape: bf16[16,8,128], index: 0, kind: input, shape index: {}]   ;;  %s852_s1 = inlined_call_operand.vmem [shape: bf16[16,128,128], index: 1, kind: input, shape index: {}]   ;;  %s853_s2 = inlined_call_operand.vmem [shape: f32[16,8,128], index: 2, kind: output, shape index: {0}]   ;;  %s854_s3 = inlined_call_operand.vmem [shape: f32[1,128], index: 3, kind: output, shape index: {1}]   ;;  %s855_s4 = inlined_call_operand.vmem [shape: f32[1,128], index: 4, kind: output, shape index: {2}]  }
   0x1   :  { %s789_s17 = smov 0  }
   0x2 LB: > { %s37_s18 = sadd.s32 1, %s751_s16  ;;  %p643_p0 = scmp.ge.s32.totalorder %s755_s17, 1  ;;  %s755_s17 = sphi %s789_s17, %s15_s17   ;;  %s751_s16 = sphi %s787_s16, %s857_s16   ;;  %s747_s15 = sphi %s785_s15, %s856_s15  }
   0x3   : > { %p39_p1 = scmp.ge.s32.totalorder %s37_s18, 16  ;;  %p228_p2 = scmp.lt.s32.totalorder %s755_s17, 17 }
   0x5   : > { %s859_s18 = smov (%p39_p1, %s37_s18), 0  ;;  %p229_p3 = pnand %p643_p0, %p228_p2 }
   0x6   : > { %p282_p4 = scmp.lt.s32.totalorder (!%p229_p3), %s747_s15, 15  ;;  %p322_p5 = scmp.eq.s32.totalorder (!%p229_p3), %s747_s15, 0 }
   0x7   : > { %232 = sbr.rel (%p229_p3) target bundleno = 292 (0x124), region = 28 }
   0xe   : > { %s283_s19 = scalar_select %p282_p4, %s747_s15, 15 }
   0xf   : > { %330 = sbr.rel (!%p322_p5) target bundleno = 22 (0x16), region = 32  ;;  %v757_v0 = vmov (%p322_p5), 0.0  }
  0x10   : > { %s644_s20 = sshll.u32 %s283_s19, 2  ;;  %s664_s21 = sshll.u32 %s283_s19, 6  ;;  %331 = vst [vmem:[#allocation3] sm:$0x1] (%p322_p5), %v757_v0  ;;  %332 = vst [vmem:[#allocation4] sm:$0x1] (%p322_p5), %v757_v0 }
  0x11   : > { %s811_s24 = scalar_lea.vmem %s851_s0, %s644_s20  ;;  %s816_s27 = scalar_lea.vmem %s852_s1, %s664_s21 }
  0x12   : > { %s647_s28 = sshll.u32 %s283_s19, 3 }
  0x13   : > { %s821_s5 = scalar_lea.vmem %s853_s2, %s647_s28 }
  0x16 PF: > { %v725_v1 = vld [vmem:[%s816_s27] sm:$0xff]   ;;  %v758_v2 = vmov 0.0   ;;  %v726_v3 = vld [vmem:[%s816_s27 + $0x8] sm:$0xff]   ;;  %vm759_vm0 = vmmov 0   ;;  %v727_v4 = vld [vmem:[%s816_s27 + $0x10] sm:$0xff]   ;;  %p469_p6 = scmp.eq.s32.totalorder %s747_s15, 15 }
  0x17   : > { %678 = vmatprep.subr.bf16.mxu0 %v758_v2  ;;  %694 = vmatprep.mubr.msk.bf16.mxu0 %vm759_vm0, %v758_v2  ;;  %v728_v5 = vld [vmem:[%s816_s27 + $0x18] sm:$0xff]   ;;  %v729_v6 = vld [vmem:[%s816_s27 + $0x20] sm:$0xff]   ;;  %v730_v7 = vld [vmem:[%s816_s27 + $0x28] sm:$0xff]  }
  0x18   : > { %679 = vmatpush3.bf16.msra.mxu0 %v725_v1  ;;  %v731_v8 = vld [vmem:[%s816_s27 + $0x30] sm:$0xff]   ;;  %v732_v9 = vld [vmem:[%s816_s27 + $0x38] sm:$0xff]   ;;  %v338_v10 = vld [vmem:[%s811_s24] sm:$0xf] }
  0x19   : > { %680 = vmatprep.subr.bf16.mxu0 %v758_v2  ;;  %v450_v25 = vld [vmem:[#allocation3] sm:$0x1]  ;;  %v459_v28 = vld [vmem:[#allocation4] sm:$0x1] }
  0x1c   : > { %681 = vmatpush3.bf16.msra.mxu0 %v726_v3 }
  0x1d   : > { %682 = vmatprep.subr.bf16.mxu0 %v758_v2 }
  0x20   : > { %683 = vmatpush3.bf16.msra.mxu0 %v727_v4 }
  0x21   : > { %684 = vmatprep.subr.bf16.mxu0 %v758_v2 }
  0x24   : > { %685 = vmatpush3.bf16.msra.mxu0 %v728_v5 }
  0x25   : > { %686 = vmatprep.subr.bf16.mxu0 %v758_v2 }
  0x28   : > { %687 = vmatpush3.bf16.msra.mxu0 %v729_v6 }
  0x29   : > { %688 = vmatprep.subr.bf16.mxu0 %v758_v2 }
  0x2c   : > { %689 = vmatpush3.bf16.msra.mxu0 %v730_v7 }
  0x2d   : > { %690 = vmatprep.subr.bf16.mxu0 %v758_v2 }
  0x30   : > { %691 = vmatpush3.bf16.msra.mxu0 %v731_v8 }
  0x31   : > { %692 = vmatprep.subr.bf16.mxu0 %v758_v2 }
  0x34   : > { %693 = vmatpush3.bf16.msra.mxu0 %v732_v9 }
  0x37   : > { %695 = vmatmul.mubr.bf16.vlgmr.msra.gmra.mrb[0].mxu0 %v338_v10 }
 0x10a   : > { %v437_v11 = vpop.f32.mrb[0].mxu0 }
 0x10b   : > { %449 = vst [vmem:[%s821_s5] sm:$0xff] %v437_v11  ;;  %v451_v12 = vrot.slane %v437_v11, 4  ;;  %v460_v13 = vmul.f32 %v437_v11, %v437_v11  ;;  %v696_v14 = vpop.f32.mrb[1].mxu0 }
 0x10c   : > { %v440_v15 = vpop.f32.mrb[2].mxu0 }
 0x10d   : > { %v452_v16 = vadd.f32 %v451_v12, %v437_v11  ;;  %v461_v17 = vrot.slane %v460_v13, 4  ;;  %v697_v18 = vpop.f32.mrb[3].mxu0 }
 0x10f   : > { %v453_v19 = vrot.slane %v452_v16, 2  ;;  %v462_v20 = vadd.f32 %v461_v17, %v460_v13 }
 0x111   : > { %v454_v21 = vadd.f32 %v453_v19, %v452_v16  ;;  %v463_v22 = vrot.slane %v462_v20, 2 }
 0x113   : > { %v455_v23 = vrot.slane %v454_v21, 1  ;;  %v464_v24 = vadd.f32 %v463_v22, %v462_v20 }
 0x115   : > { %v456_v26 = vadd.f32 %v455_v23, %v454_v21  ;;  %v465_v27 = vrot.slane %v464_v24, 1  ;;  %475 = sbr.rel (!%p469_p6) target bundleno = 292 (0x124), region = 44 }
 0x117   : > { %v457_v29 = vadd.f32 %v456_v26, %v450_v25  ;;  %v466_v30 = vadd.f32 %v465_v27, %v464_v24 }
 0x119   : > { %458 = vst [vmem:[#allocation3] sm:$0x1] %v457_v29  ;;  %v467_v31 = vadd.f32 %v466_v30, %v459_v28 }
 0x11b   : > { %468 = vst [vmem:[#allocation4] sm:$0x1] %v467_v31 }
 0x120   : > { %v476_v32 = vld [vmem:[#allocation3] sm:$0x1] }
 0x121   : > { %477 = vst [vmem:[%s854_s3] sm:$0x1] %v476_v32 }
 0x122   : > { %v478_v33 = vld [vmem:[#allocation4] sm:$0x1] }
 0x123   : > { %479 = vst [vmem:[%s855_s4] sm:$0x1] %v478_v33 }
 0x124 PF: > { %s15_s17 = sadd.s32 1, %s755_s17   ;;  %s856_s15 = smov %s751_s16 }
 0x125   : > { %p12_p7 = scmp.ge.s32.totalorder %s15_s17, 18   ;;  %s857_s16 = smov %s859_s18 }
 0x127   :  { %14 = sbr.rel (!%p12_p7) target bundleno = 2 (0x2), region = 101 }

// kernel: decoder_forward.8
= control target key start
LH: loop header
LB: loop body
LE: loop exit
PB: predicated region body
PF: predicated region fallthrough
CT: control target
= control target key end

     0   :  { %s452_s12 = smov 0   ;;  %s454_s13 = smov 0   ;;  %s491_s0 = inlined_call_operand.vmem [shape: f32[128,128], index: 0, kind: input, shape index: {}]   ;;  %s492_s1 = inlined_call_operand.vmem [shape: f32[1,128], index: 1, kind: input, shape index: {}]   ;;  %s493_s2 = inlined_call_operand.vmem [shape: f32[1,128], index: 2, kind: input, shape index: {}]   ;;  %s494_s3 = inlined_call_operand.vmem [shape: f32[128,128], index: 3, kind: output, shape index: {}]  }
   0x1   :  { %s456_s14 = smov 0  }
   0x2 LB: > { %s25_s15 = sadd.s32 1, %s426_s13  ;;  %p375_p0 = scmp.ge.s32.totalorder %s430_s14, 1  ;;  %s430_s14 = sphi %s456_s14, %s13_s14   ;;  %s426_s13 = sphi %s454_s13, %s496_s13   ;;  %s422_s12 = sphi %s452_s12, %s495_s12  }
   0x3   : > { %p27_p1 = scmp.ge.s32.totalorder %s25_s15, 4  ;;  %p173_p2 = scmp.lt.s32.totalorder %s430_s14, 5 }
   0x5   : > { %s498_s15 = smov (%p27_p1, %s25_s15), 0  ;;  %p174_p3 = pnand %p375_p0, %p173_p2 }
   0x6   : > { %s376_s16 = sshll.u32 (!%p174_p3), %s422_s12, 2  ;;  %v380_v0 = vld [vmem:[%s492_s1] ss:$0 sm:$0xff] (!%p174_p3) }
   0x7   : > { %177 = sbr.rel (%p174_p3) target bundleno = 26 (0x1a), region = 32  ;;  %p210_p4 = scmp.lt.s32.totalorder (!%p174_p3), %s376_s16, 15  ;;  %v381_v1 = vld [vmem:[%s493_s2] ss:$0 sm:$0xff] (!%p174_p3) }
   0xe   : > { %s500_s16 = smov (!%p210_p4, %s376_s16), 15 }
   0xf   : > { %s377_s17 = sshll.u32 %s500_s16, 3 }
  0x10   : > { %s216_s22 = scalar_lea.vmem %s491_s0, %s377_s17  ;;  %s231_s27 = scalar_lea.vmem %s494_s3, %s377_s17 }
  0x11   : > { %v233_v2 = vld [vmem:[%s216_s22] sm:$0xff]  ;;  %v234_v3 = vld [vmem:[%s216_s22 + $0x8] sm:$0xff]  ;;  %v235_v4 = vld [vmem:[%s216_s22 + $0x10] sm:$0xff] }
  0x12   : > { %v244_v5 = vmul.f32 %v380_v0, %v233_v2  ;;  %v245_v6 = vmul.f32 %v380_v0, %v234_v3  ;;  %v246_v7 = vmul.f32 %v380_v0, %v235_v4  ;;  %v236_v8 = vld [vmem:[%s216_s22 + $0x18] sm:$0xff] }
  0x13   : > { %v247_v9 = vmul.f32 %v380_v0, %v236_v8 }
  0x14   : > { %v255_v10 = vadd.f32 %v381_v1, %v244_v5  ;;  %v256_v11 = vadd.f32 %v381_v1, %v245_v6  ;;  %v257_v12 = vadd.f32 %v381_v1, %v246_v7 }
  0x15   : > { %v258_v13 = vadd.f32 %v381_v1, %v247_v9 }
  0x16   : > { %v259_v14 = vmax.f32 %v255_v10, 0.0  ;;  %v260_v15 = vmax.f32 %v256_v11, 0.0  ;;  %v261_v16 = vmax.f32 %v257_v12, 0.0 }
  0x17   : > { %v262_v17 = vmax.f32 %v258_v13, 0.0 }
  0x18   : > { %263 = vst [vmem:[%s231_s27] sm:$0xff] %v259_v14  ;;  %264 = vst [vmem:[%s231_s27 + $0x8] sm:$0xff] %v260_v15 }
  0x19   : > { %265 = vst [vmem:[%s231_s27 + $0x10] sm:$0xff] %v261_v16  ;;  %266 = vst [vmem:[%s231_s27 + $0x18] sm:$0xff] %v262_v17 }
  0x1a PF: > { %s13_s14 = sadd.s32 1, %s430_s14   ;;  %s495_s12 = smov %s426_s13 }
  0x1b   : > { %p10_p5 = scmp.ge.s32.totalorder %s13_s14, 6   ;;  %s496_s13 = smov %s498_s15 }
  0x1d   :  { %12 = sbr.rel (!%p10_p5) target bundleno = 2 (0x2), region = 68 }

// kernel: decoder_forward.7
= control target key start
LH: loop header
LB: loop body
LE: loop exit
PB: predicated region body
PF: predicated region fallthrough
CT: control target
= control target key end

     0   :  { %s866_s15 = smov 0   ;;  %s868_s16 = smov 0   ;;  %s926_s0 = inlined_call_operand.vmem [shape: bf16[4,32,128], index: 0, kind: input, shape index: {}]   ;;  %s927_s1 = inlined_call_operand.vmem [shape: bf16[4,128,128], index: 1, kind: input, shape index: {}]   ;;  %s928_s2 = inlined_call_operand.vmem [shape: f32[4,32,128], index: 2, kind: output, shape index: {0}]   ;;  %s929_s3 = inlined_call_operand.vmem [shape: f32[1,128], index: 3, kind: output, shape index: {1}]   ;;  %s930_s4 = inlined_call_operand.vmem [shape: f32[1,128], index: 4, kind: output, shape index: {2}]  }
   0x1   :  { %s870_s17 = smov 0  }
   0x2 LB: > { %s37_s18 = sadd.s32 1, %s834_s16  ;;  %p719_p0 = scmp.ge.s32.totalorder %s838_s17, 1  ;;  %s838_s17 = sphi %s870_s17, %s15_s17   ;;  %s834_s16 = sphi %s868_s16, %s932_s16   ;;  %s830_s15 = sphi %s866_s15, %s931_s15  }
   0x3   : > { %p39_p1 = scmp.ge.s32.totalorder %s37_s18, 4  ;;  %p231_p2 = scmp.lt.s32.totalorder %s838_s17, 5 }
   0x5   : > { %s934_s18 = smov (%p39_p1, %s37_s18), 0  ;;  %p232_p3 = pnand %p719_p0, %p231_p2 }
   0x6   : > { %p290_p4 = scmp.lt.s32.totalorder (!%p232_p3), %s830_s15, 3  ;;  %p335_p5 = scmp.eq.s32.totalorder (!%p232_p3), %s830_s15, 0 }
   0x7   : > { %235 = sbr.rel (%p232_p3) target bundleno = 301 (0x12d), region = 28 }
   0xe   : > { %s291_s19 = scalar_select %p290_p4, %s830_s15, 3 }
   0xf   : > { %343 = sbr.rel (!%p335_p5) target bundleno = 22 (0x16), region = 32  ;;  %v840_v0 = vmov (%p335_p5), 0.0  }
  0x10   : > { %s744_s20 = sshll.u32 %s291_s19, 4  ;;  %s745_s21 = sshll.u32 %s291_s19, 6  ;;  %344 = vst [vmem:[#allocation3] sm:$0x1] (%p335_p5), %v840_v0  ;;  %345 = vst [vmem:[#allocation4] sm:$0x1] (%p335_p5), %v840_v0 }
  0x11   : > { %s892_s24 = scalar_lea.vmem %s926_s0, %s744_s20  ;;  %s313_s27 = scalar_lea.vmem %s927_s1, %s745_s21 }
  0x12   : > { %s746_s28 = sshll.u32 %s291_s19, 5 }
  0x13   : > { %s900_s5 = scalar_lea.vmem %s928_s2, %s746_s28 }
  0x16 PF: > { %v806_v1 = vld [vmem:[%s313_s27] sm:$0xff]   ;;  %v807_v2 = vld [vmem:[%s313_s27 + $0x8] sm:$0xff]   ;;  %v808_v3 = vld [vmem:[%s313_s27 + $0x10] sm:$0xff]   ;;  %p533_p6 = scmp.eq.s32.totalorder %s830_s15, 3 }
  0x17   : > { %761 = vmatprep.subr.bf16.mxu0 %v806_v1  ;;  %v809_v4 = vld [vmem:[%s313_s27 + $0x18] sm:$0xff]   ;;  %v814_v5 = vld [vmem:[%s892_s24] sm:$0xff]   ;;  %v811_v7 = vld [vmem:[%s313_s27 + $0x28] sm:$0xff]  }
  0x18   : > { %762 = vmatpush3.bf16.msra.mxu0 %v806_v1  ;;  %777 = vmatprep.mubr.bf16.mxu0 %v814_v5  ;;  %v810_v6 = vld [vmem:[%s313_s27 + $0x20] sm:$0xff]   ;;  %v812_v8 = vld [vmem:[%s313_s27 + $0x30] sm:$0xff]   ;;  %v813_v9 = vld [vmem:[%s313_s27 + $0x38] sm:$0xff]  }
  0x19   : > { %763 = vmatprep.subr.bf16.mxu0 %v807_v2  ;;  %v815_v10 = vld [vmem:[%s892_s24 + $0x8] sm:$0xff]   ;;  %v505_v34 = vld [vmem:[#allocation3] sm:$0x1]  ;;  %v517_v37 = vld [vmem:[#allocation4] sm:$0x1] }
  0x1c   : > { %764 = vmatpush3.bf16.msra.mxu0 %v807_v2 }
  0x1d   : > { %765 = vmatprep.subr.bf16.mxu0 %v808_v3 }
  0x20   : > { %766 = vmatpush3.bf16.msra.mxu0 %v808_v3 }
  0x21   : > { %767 = vmatprep.subr.bf16.mxu0 %v809_v4 }
  0x24   : > { %768 = vmatpush3.bf16.msra.mxu0 %v809_v4 }
  0x25   : > { %769 = vmatprep.subr.bf16.mxu0 %v810_v6 }
  0x28   : > { %770 = vmatpush3.bf16.msra.mxu0 %v810_v6 }
  0x29   : > { %771 = vmatprep.subr.bf16.mxu0 %v811_v7 }
  0x2c   : > { %772 = vmatpush3.bf16.msra.mxu0 %v811_v7 }
  0x2d   : > { %773 = vmatprep.subr.bf16.mxu0 %v812_v8 }
  0x30   : > { %774 = vmatpush3.bf16.msra.mxu0 %v812_v8 }
  0x31   : > { %775 = vmatprep.subr.bf16.mxu0 %v813_v9 }
  0x34   : > { %776 = vmatpush3.bf16.msra.mxu0 %v813_v9 }
  0x37   : > { %778 = vmatmul.mubr.bf16.vlgmr.msra.gmra.mrb[0].mxu0 %v815_v10 }
 0x10a   : > { %v779_v11 = vpop.f32.mrb[0].mxu0 }
 0x10b   : > { %503 = vst [vmem:[%s900_s5 + $0x10] sm:$0xff] %v779_v11  ;;  %v471_v12 = vpop.f32.mrb[1].mxu0  ;;  %v520_v18 = vmul.f32 %v779_v11, %v779_v11 }
 0x10c   : > { %501 = vst [vmem:[%s900_s5] sm:$0xff] %v471_v12  ;;  %v780_v13 = vpop.f32.mrb[2].mxu0  ;;  %v518_v15 = vmul.f32 %v471_v12, %v471_v12 }
 0x10d   : > { %504 = vst [vmem:[%s900_s5 + $0x18] sm:$0xff] %v780_v13  ;;  %v474_v14 = vpop.f32.mrb[3].mxu0  ;;  %v521_v21 = vmul.f32 %v780_v13, %v780_v13 }
 0x10e   : > { %502 = vst [vmem:[%s900_s5 + $0x8] sm:$0xff] %v474_v14  ;;  %v506_v16 = vadd.f32 %v474_v14, %v471_v12  ;;  %v519_v17 = vmul.f32 %v474_v14, %v474_v14 }
 0x110   : > { %v507_v19 = vadd.f32 %v779_v11, %v506_v16  ;;  %v522_v20 = vadd.f32 %v519_v17, %v518_v15 }
 0x112   : > { %v508_v22 = vadd.f32 %v780_v13, %v507_v19  ;;  %v523_v23 = vadd.f32 %v522_v20, %v520_v18 }
 0x114   : > { %v509_v24 = vrot.slane %v508_v22, 4  ;;  %v524_v25 = vadd.f32 %v523_v23, %v521_v21 }
 0x116   : > { %v510_v26 = vadd.f32 %v509_v24, %v508_v22  ;;  %v525_v27 = vrot.slane %v524_v25, 4 }
 0x118   : > { %v511_v28 = vrot.slane %v510_v26, 2  ;;  %v526_v29 = vadd.f32 %v525_v27, %v524_v25 }
 0x11a   : > { %v512_v30 = vadd.f32 %v511_v28, %v510_v26  ;;  %v527_v31 = vrot.slane %v526_v29, 2 }
 0x11c   : > { %v513_v32 = vrot.slane %v512_v30, 1  ;;  %v528_v33 = vadd.f32 %v527_v31, %v526_v29 }
 0x11e   : > { %v514_v35 = vadd.f32 %v513_v32, %v512_v30  ;;  %v529_v36 = vrot.slane %v528_v33, 1  ;;  %539 = sbr.rel (!%p533_p6) target bundleno = 301 (0x12d), region = 44 }
 0x120   : > { %v515_v38 = vadd.f32 %v514_v35, %v505_v34  ;;  %v530_v39 = vadd.f32 %v529_v36, %v528_v33 }
 0x122   : > { %516 = vst [vmem:[#allocation3] sm:$0x1] %v515_v38  ;;  %v531_v40 = vadd.f32 %v530_v39, %v517_v37 }
 0x124   : > { %532 = vst [vmem:[#allocation4] sm:$0x1] %v531_v40 }
 0x129   : > { %v540_v41 = vld [vmem:[#allocation3] sm:$0x1] }
 0x12a   : > { %541 = vst [vmem:[%s929_s3] sm:$0x1] %v540_v41 }
 0x12b   : > { %v542_v42 = vld [vmem:[#allocation4] sm:$0x1] }
 0x12c   : > { %543 = vst [vmem:[%s930_s4] sm:$0x1] %v542_v42 }
 0x12d PF: > { %s15_s17 = sadd.s32 1, %s838_s17   ;;  %s931_s15 = smov %s834_s16 }
 0x12e   : > { %p12_p7 = scmp.ge.s32.totalorder %s15_s17, 6   ;;  %s932_s16 = smov %s934_s18 }
 0x130   :  { %14 = sbr.rel (!%p12_p7) target bundleno = 2 (0x2), region = 101 }

// kernel: decoder_forward.9
= control target key start
LH: loop header
LB: loop body
LE: loop exit
PB: predicated region body
PF: predicated region fallthrough
CT: control target
= control target key end

     0   :  { %s942_s9 = smov 0   ;;  %s944_s10 = smov 0   ;;  %s1020_s0 = inlined_call_operand.vmem [shape: bf16[4,128,128], index: 0, kind: input, shape index: {}]   ;;  %s1021_s1 = inlined_call_operand.vmem [shape: bf16[4,128,128], index: 1, kind: input, shape index: {}]   ;;  %s1022_s2 = inlined_call_operand.vmem [shape: f32[4,128,128], index: 2, kind: output, shape index: {}]  }
   0x1   :  { %s946_s11 = smov 0  }
   0x2 LB: > { %s34_s12 = sadd.s32 1, %s921_s10  ;;  %p739_p0 = scmp.ge.s32.totalorder %s925_s11, 1  ;;  %s925_s11 = sphi %s946_s11, %s12_s11   ;;  %s921_s10 = sphi %s944_s10, %s1024_s10   ;;  %s917_s9 = sphi %s942_s9, %s1023_s9  }
   0x3   : > { %p36_p1 = scmp.ge.s32.totalorder %s34_s12, 4  ;;  %p176_p2 = scmp.lt.s32.totalorder %s925_s11, 5 }
   0x5   : > { %s1026_s12 = smov (%p36_p1, %s34_s12), 0  ;;  %p177_p3 = pnand %p739_p0, %p176_p2 }
   0x6   : > { %p225_p4 = scmp.lt.s32.totalorder (!%p177_p3), %s917_s9, 3 }
   0x7   : > { %180 = sbr.rel (%p177_p3) target bundleno = 289 (0x121), region = 28 }
   0xe   : > { %s1028_s9 = smov (!%p225_p4, %s917_s9), 3 }
   0xf   : > { %s764_s13 = sshll.u32 %s1028_s9, 6  ;;  %s766_s20 = sshll.u32 %s1028_s9, 7 }
  0x10   : > { %s966_s16 = scalar_lea.vmem %s1021_s1, %s764_s13  ;;  %s974_s19 = scalar_lea.vmem %s1020_s0, %s764_s13 }
  0x11   : > { %v855_v0 = vld [vmem:[%s966_s16] sm:$0xff]   ;;  %v856_v1 = vld [vmem:[%s966_s16 + $0x8] sm:$0xff]   ;;  %v857_v2 = vld [vmem:[%s966_s16 + $0x10] sm:$0xff]   ;;  %s993_s23 = scalar_lea.vmem %s1022_s2, %s766_s20 }
  0x12   : > { %783 = vmatprep.subr.bf16.mxu0 %v855_v0  ;;  %815 = vmatprep.subr.bf16.mxu1 %v855_v0  ;;  %v858_v3 = vld [vmem:[%s966_s16 + $0x18] sm:$0xff]   ;;  %v863_v4 = vld [vmem:[%s974_s19] sm:$0xff]   ;;  %v860_v7 = vld [vmem:[%s966_s16 + $0x28] sm:$0xff]  }
  0x13   : > { %784 = vmatpush3.bf16.msra.mxu0 %v855_v0  ;;  %823 = vmatpush3.bf16.msra.mxu1 %v855_v0  ;;  %v864_v5 = vld [vmem:[%s974_s19 + $0x20] sm:$0xff]   ;;  %v861_v8 = vld [vmem:[%s966_s16 + $0x30] sm:$0xff]   ;;  %v862_v9 = vld [vmem:[%s966_s16 + $0x38] sm:$0xff]  }
  0x14   : > { %785 = vmatprep.subr.bf16.mxu0 %v856_v1  ;;  %816 = vmatprep.subr.bf16.mxu1 %v856_v1  ;;  %v859_v6 = vld [vmem:[%s966_s16 + $0x20] sm:$0xff]   ;;  %v865_v10 = vld [vmem:[%s974_s19 + $0x8] sm:$0xff]   ;;  %v867_v12 = vld [vmem:[%s974_s19 + $0x10] sm:$0xff]  }
  0x15   : > { %799 = vmatprep.mubr.bf16.mxu0 %v863_v4  ;;  %807 = vmatprep.mubr.bf16.mxu1 %v864_v5  ;;  %v866_v11 = vld [vmem:[%s974_s19 + $0x28] sm:$0xff]   ;;  %v868_v13 = vld [vmem:[%s974_s19 + $0x30] sm:$0xff]   ;;  %v869_v14 = vld [vmem:[%s974_s19 + $0x18] sm:$0xff]  }
  0x16   : > { %v870_v15 = vld [vmem:[%s974_s19 + $0x38] sm:$0xff]  }
  0x17   : > { %786 = vmatpush3.bf16.msra.mxu0 %v856_v1  ;;  %824 = vmatpush3.bf16.msra.mxu1 %v856_v1 }
  0x18   : > { %787 = vmatprep.subr.bf16.mxu0 %v857_v2  ;;  %817 = vmatprep.subr.bf16.mxu1 %v857_v2 }
  0x1b   : > { %788 = vmatpush3.bf16.msra.mxu0 %v857_v2  ;;  %825 = vmatpush3.bf16.msra.mxu1 %v857_v2 }
  0x1c   : > { %789 = vmatprep.subr.bf16.mxu0 %v858_v3  ;;  %818 = vmatprep.subr.bf16.mxu1 %v858_v3 }
  0x1f   : > { %790 = vmatpush3.bf16.msra.mxu0 %v858_v3  ;;  %826 = vmatpush3.bf16.msra.mxu1 %v858_v3 }
  0x20   : > { %791 = vmatprep.subr.bf16.mxu0 %v859_v6  ;;  %819 = vmatprep.subr.bf16.mxu1 %v859_v6 }
  0x23   : > { %792 = vmatpush3.bf16.msra.mxu0 %v859_v6  ;;  %827 = vmatpush3.bf16.msra.mxu1 %v859_v6 }
  0x24   : > { %793 = vmatprep.subr.bf16.mxu0 %v860_v7  ;;  %820 = vmatprep.subr.bf16.mxu1 %v860_v7 }
  0x27   : > { %794 = vmatpush3.bf16.msra.mxu0 %v860_v7  ;;  %828 = vmatpush3.bf16.msra.mxu1 %v860_v7 }
  0x28   : > { %795 = vmatprep.subr.bf16.mxu0 %v861_v8  ;;  %821 = vmatprep.subr.bf16.mxu1 %v861_v8 }
  0x2b   : > { %796 = vmatpush3.bf16.msra.mxu0 %v861_v8  ;;  %829 = vmatpush3.bf16.msra.mxu1 %v861_v8 }
  0x2c   : > { %797 = vmatprep.subr.bf16.mxu0 %v862_v9  ;;  %822 = vmatprep.subr.bf16.mxu1 %v862_v9 }
  0x2f   : > { %798 = vmatpush3.bf16.msra.mxu0 %v862_v9  ;;  %830 = vmatpush3.bf16.msra.mxu1 %v862_v9 }
  0x32   : > { %800 = vmatmul.mubr.bf16.vlgmr.msra.gmra.mrb[0].mxu0 %v865_v10  ;;  %808 = vmatmul.mubr.bf16.vlgmr.msra.gmra.mrb[0].mxu1 %v866_v11 }
  0x33   : > { %803 = vmatprep.mubr.bf16.mxu0 %v867_v12  ;;  %811 = vmatprep.mubr.bf16.mxu1 %v868_v13 }
  0x3a   : > { %804 = vmatmul.mubr.bf16.gmra.mrb[4].mxu0 %v869_v14  ;;  %812 = vmatmul.mubr.bf16.gmra.mrb[4].mxu1 %v870_v15 }
 0x105   : > { %v801_v16 = vpop.f32.mrb[0].mxu0  ;;  %v809_v17 = vpop.f32.mrb[0].mxu1 }
 0x106   : > { %871 = vtanh.f32 %v801_v16  ;;  %v462_v18 = vpop.f32.mrb[1].mxu0  ;;  %v494_v19 = vpop.f32.mrb[1].mxu1 }
 0x107   : > { %873 = vtanh.f32 %v809_v17  ;;  %v802_v20 = vpop.f32.mrb[2].mxu0  ;;  %v810_v21 = vpop.f32.mrb[2].mxu1 }
 0x108   : > { %875 = vtanh.f32 %v462_v18  ;;  %v465_v22 = vpop.f32.mrb[3].mxu0  ;;  %v497_v23 = vpop.f32.mrb[3].mxu1 }
 0x109   : > { %877 = vtanh.f32 %v494_v19 }
 0x10a   : > { %879 = vtanh.f32 %v802_v20 }
 0x10b   : > { %881 = vtanh.f32 %v810_v21 }
 0x10c   : > { %883 = vtanh.f32 %v465_v22 }
 0x10d   : > { %885 = vtanh.f32 %v497_v23  ;;  %v805_v24 = vpop.f32.mrb[4].mxu0  ;;  %v813_v25 = vpop.f32.mrb[4].mxu1 }
 0x10e   : > { %887 = vtanh.f32 %v805_v24  ;;  %v478_v26 = vpop.f32.mrb[5].mxu0  ;;  %v510_v27 = vpop.f32.mrb[5].mxu1 }
 0x10f   : > { %889 = vtanh.f32 %v813_v25  ;;  %v806_v28 = vpop.f32.mrb[6].mxu0  ;;  %v814_v29 = vpop.f32.mrb[6].mxu1 }
 0x110   : > { %v872_v30 = vpop.eup %871  ;;  %891 = vtanh.f32 %v478_v26  ;;  %v481_v31 = vpop.f32.mrb[7].mxu0 }
 0x111   : > { %v513_v32 = vpop.f32.mrb[7].mxu1  ;;  %v874_v33 = vpop.eup %873  ;;  %594 = vst [vmem:[%s993_s23 + $0x10] sm:$0xff] %v872_v30  ;;  %893 = vtanh.f32 %v510_v27 }
 0x112   : > { %v876_v34 = vpop.eup %875  ;;  %602 = vst [vmem:[%s993_s23 + $0x50] sm:$0xff] %v874_v33  ;;  %895 = vtanh.f32 %v806_v28 }
 0x113   : > { %v878_v35 = vpop.eup %877  ;;  %592 = vst [vmem:[%s993_s23] sm:$0xff] %v876_v34  ;;  %897 = vtanh.f32 %v814_v29 }
 0x114   : > { %v880_v36 = vpop.eup %879  ;;  %600 = vst [vmem:[%s993_s23 + $0x40] sm:$0xff] %v878_v35  ;;  %899 = vtanh.f32 %v481_v31 }
 0x115   : > { %v882_v37 = vpop.eup %881  ;;  %595 = vst [vmem:[%s993_s23 + $0x18] sm:$0xff] %v880_v36  ;;  %901 = vtanh.f32 %v513_v32 }
 0x116   : > { %v884_v38 = vpop.eup %883  ;;  %603 = vst [vmem:[%s993_s23 + $0x58] sm:$0xff] %v882_v37 }
 0x117   : > { %v886_v39 = vpop.eup %885  ;;  %593 = vst [vmem:[%s993_s23 + $0x8] sm:$0xff] %v884_v38 }
 0x118   : > { %v888_v40 = vpop.eup %887  ;;  %601 = vst [vmem:[%s993_s23 + $0x48] sm:$0xff] %v886_v39 }
 0x119   : > { %v890_v41 = vpop.eup %889  ;;  %598 = vst [vmem:[%s993_s23 + $0x30] sm:$0xff] %v888_v40 }
 0x11a   : > { %v892_v42 = vpop.eup %891  ;;  %606 = vst [vmem:[%s993_s23 + $0x70] sm:$0xff] %v890_v41 }
 0x11b   : > { %v894_v43 = vpop.eup %893  ;;  %596 = vst [vmem:[%s993_s23 + $0x20] sm:$0xff] %v892_v42 }
 0x11c   : > { %v896_v44 = vpop.eup %895  ;;  %604 = vst [vmem:[%s993_s23 + $0x60] sm:$0xff] %v894_v43 }
 0x11d   : > { %v898_v45 = vpop.eup %897  ;;  %599 = vst [vmem:[%s993_s23 + $0x38] sm:$0xff] %v896_v44 }
 0x11e   : > { %v900_v46 = vpop.eup %899  ;;  %607 = vst [vmem:[%s993_s23 + $0x78] sm:$0xff] %v898_v45 }
 0x11f   : > { %v902_v47 = vpop.eup %901  ;;  %597 = vst [vmem:[%s993_s23 + $0x28] sm:$0xff] %v900_v46 }
 0x120   : > { %605 = vst [vmem:[%s993_s23 + $0x68] sm:$0xff] %v902_v47 }
 0x121 PF: > { %s12_s11 = sadd.s32 1, %s925_s11   ;;  %s1023_s9 = smov %s921_s10 }
 0x122   : > { %p9_p5 = scmp.ge.s32.totalorder %s12_s11, 6   ;;  %s1024_s10 = smov %s1026_s12 }
 0x124   :  { %11 = sbr.rel (!%p9_p5) target bundleno = 2 (0x2), region = 69 }

</bundles_post_ra>
